<compile_context>
chip_gen: v7x
topology: tpu7x:2x2x1
jax: 0.10.0
libtpu: 0.0.40
codegen_flags: <defaults>
</compile_context>

<pallas_src>
import jax
import jax.numpy as jnp
from jax.experimental import pallas as pl
from jax.experimental.pallas import tpu as pltpu


def _round_up(n, m):
    return ((n + m - 1) // m) * m


def _vmem_capacity_bytes():
    """Physical VMEM of the attached TPU; conservative 64 MiB (v7x) fallback."""
    try:
        info = pltpu.get_tpu_info()
        cap = int(getattr(info, "vmem_capacity_bytes", 0) or 0)
        if cap > 0:
            return cap
    except Exception:
        pass
    return 64 * 1024 * 1024


def mlm_kernel(x_ref, w1_ref, b1_ref, w2_ref, b2_ref, o_ref, h_ref):
    # Grid = (token tiles i, vocab tiles j); j innermost.
    # h = relu(x @ W1 + b1) depends only on the token tile, so it is computed
    # once per token tile (j == 0) into the persistent VMEM scratch and reused
    # for every vocab tile.  This requires grid axis 1 to execute sequentially
    # on the core owning token tile i -> axis 1 must stay "arbitrary" (never
    # parallel / core_parallel).
    @pl.when(pl.program_id(1) == 0)
    def _():
        h = jnp.dot(x_ref[...], w1_ref[...], preferred_element_type=jnp.float32)
        h_ref[...] = jnp.maximum(h + b1_ref[...], 0.0).astype(h_ref.dtype)

    out = jnp.dot(h_ref[...], w2_ref[...], preferred_element_type=jnp.float32)
    o_ref[...] = (out + b2_ref[...]).astype(o_ref.dtype)


def _plan_tiles(M, H, V, cdt_bytes, out_bytes, vmem_cap, tm_max=None, tv_max=None):
    """Generation-aware (VMEM-capacity-aware) tile plan."""
    Hp = _round_up(H, 128)
    budget = int(vmem_cap * 0.80)

    # 128 MiB parts (v5e/v6e) get larger vocab tiles; 64 MiB (v7x) keeps
    # TV <= 1024 to leave room for a large token tile.
    if tm_max is None:
        tm_max = 512
    if tv_max is None:
        tv_max = 2048 if vmem_cap >= 96 * 1024 * 1024 else 1024

    TM = min(tm_max, _round_up(M, 8))
    TV = min(tv_max, _round_up(V, 128))
    if TV > 256:
        TV = max(256, (TV // 256) * 256)   # match the 256-wide MXU on v6e/v7x

    # v7x megacore: keep >= 2 token tiles so both TensorCores get work.
    # On 1-TC parts the extra tile costs one ~0.35us grid step - negligible.
    Mp8 = _round_up(M, 8)
    if TM >= Mp8 and Mp8 >= 256:
        TM = _round_up((Mp8 + 1) // 2, 8)

    def footprint(tm, tv):
        return (2 * Hp * Hp * cdt_bytes      # W1 (budget 2x even if Buffered(1))
                + 2 * Hp * tv * cdt_bytes    # W2 tiles (double-buffered)
                + 2 * tm * Hp * cdt_bytes    # x tiles (double-buffered)
                + 2 * tm * tv * out_bytes    # out tiles (double-buffered)
                + tm * Hp * cdt_bytes        # persistent h scratch
                + 4 * (Hp + 2 * tv) * 4)     # biases + slack

    # Shrink the (re-streamed) vocab tile first, the token tile last: HBM
    # traffic for W2 scales as (M / TM) * H * V, so TM is the lever to protect.
    while footprint(TM, TV) > budget and TV > 128:
        TV = max(128, TV // 2)
    while footprint(TM, TV) > budget and TM > 8:
        TM = max(8, _round_up(TM // 2, 8))

    return Hp, TM, TV, footprint(TM, TV)


def masked_language_model(x, w1, b1, w2, b2, *, compute_dtype=jnp.bfloat16,
                          out_dtype=None, tm_max=None, tv_max=None):
    """Fused Linear -> ReLU -> Linear.

    x : (..., H); w1: (H, H); b1: (H,); w2: (H, V); b2: (V,)  -> (..., V)

    compute_dtype: matmul-operand dtype (bf16 by default for the bf16-native
    MXUs); accumulation and biases stay f32.  Pass compute_dtype=jnp.float32
    for exact f32 numerics.  Output dtype defaults to x.dtype.
    """
    H = w1.shape[0]
    V = w2.shape[1]
    lead_shape = x.shape[:-1]
    M = 1
    for d in lead_shape:
        M *= int(d)

    if out_dtype is None:
        out_dtype = x.dtype
    cdt = jnp.dtype(compute_dtype if compute_dtype is not None else x.dtype)

    x2d = x.reshape(M, H).astype(cdt)
    w1 = w1.astype(cdt)
    w2 = w2.astype(cdt)
    b1 = b1.astype(jnp.float32)
    b2 = b2.astype(jnp.float32)

    vmem_cap = _vmem_capacity_bytes()
    Hp, TM, TV, fp = _plan_tiles(M, H, V, cdt.itemsize,
                                 jnp.dtype(out_dtype).itemsize,
                                 vmem_cap, tm_max, tv_max)
    Mp = _round_up(M, TM)
    Vp = _round_up(V, TV)

    # Zero padding is exact: padded H columns contribute 0 through both matmuls
    # (zero W1 rows / zero b1 -> relu(0)=0 -> zero W2 rows); padded M rows and
    # padded V columns are sliced off below.
    x_p = jnp.pad(x2d, ((0, Mp - M), (0, Hp - H)))
    w1_p = jnp.pad(w1, ((0, Hp - H), (0, Hp - H)))
    b1_p = jnp.pad(b1, (0, Hp - H)).reshape(1, Hp)
    w2_p = jnp.pad(w2, ((0, Hp - H), (0, Vp - V)))
    b2_p = jnp.pad(b2, (0, Vp - V)).reshape(1, Vp)

    grid = (Mp // TM, Vp // TV)

    # Clamp the scoped-VMEM request to ~85% of *physical* capacity (v7x: 64MiB).
    vmem_limit = int(min(vmem_cap * 85 // 100, max(32 * 1024 * 1024, fp * 3 // 2)))
    vmem_limit = max(vmem_limit, fp)

    def build(single_buffer_const):
        if single_buffer_const:
            # W1/b1 block index never changes -> single-buffer to free VMEM.
            w1_spec = pl.BlockSpec((Hp, Hp), lambda i, j: (0, 0),
                                   pipeline_mode=pl.Buffered(1))
            b1_spec = pl.BlockSpec((1, Hp), lambda i, j: (0, 0),
                                   pipeline_mode=pl.Buffered(1))
        else:
            w1_spec = pl.BlockSpec((Hp, Hp), lambda i, j: (0, 0))
            b1_spec = pl.BlockSpec((1, Hp), lambda i, j: (0, 0))
        return pl.pallas_call(
            mlm_kernel,
            out_shape=jax.ShapeDtypeStruct((Mp, Vp), out_dtype),
            grid_spec=pltpu.PrefetchScalarGridSpec(
                num_scalar_prefetch=0,
                grid=grid,
                in_specs=[
                    pl.BlockSpec((TM, Hp), lambda i, j: (i, 0)),   # x tile
                    w1_spec,                                       # W1 (resident)
                    b1_spec,                                       # b1
                    pl.BlockSpec((Hp, TV), lambda i, j: (0, j)),   # W2 tile
                    pl.BlockSpec((1, TV), lambda i, j: (0, j)),    # b2 tile
                ],
                out_specs=pl.BlockSpec((TM, TV), lambda i, j: (i, j)),
                # Persistent h scratch in the compute dtype (bf16 when enabled).
                scratch_shapes=[pltpu.VMEM((TM, Hp), cdt)],
            ),
            compiler_params=pltpu.CompilerParams(
                # Token axis may shard across TensorCores (v7x megacore); the
                # vocab axis MUST stay "arbitrary" (h-scratch reuse per tile).
                dimension_semantics=("parallel", "arbitrary"),
                vmem_limit_bytes=vmem_limit,
            ),
        )

    args = (x_p, w1_p, b1_p, w2_p, b2_p)
    if hasattr(pl, "Buffered"):
        try:
            out2d = build(True)(*args)
        except Exception:
            # pipeline_mode / Buffered(1) unsupported on this jax version.
            out2d = build(False)(*args)
    else:
        out2d = build(False)(*args)

    out2d = out2d[:M, :V]
    return out2d.reshape(*lead_shape, V)


class DecoderParams:
    """Deterministic synthetic parameters for DECODER ('single' header)."""

    def __init__(self, key, hidden_dim, vocab_size, dtype=jnp.float32):
        k1, k2, k3, k4 = jax.random.split(key, 4)
        s1 = 1.0 / jnp.sqrt(hidden_dim)
        # stored as (in, out) = PyTorch weight transposed
        self.w1 = jax.random.uniform(k1, (hidden_dim, hidden_dim), dtype, -s1, s1)
        self.b1 = jax.random.uniform(k2, (hidden_dim,), dtype, -s1, s1)
        self.w2 = jax.random.uniform(k3, (hidden_dim, vocab_size), dtype, -s1, s1)
        self.b2 = jax.random.uniform(k4, (vocab_size,), dtype, -s1, s1)


def decoder_forward(params, x, key_padding_mask=None, **kwargs):
    # key_padding_mask is accepted but unused, matching the PyTorch forward.
    # TODO(synk): 'multitask' header = a Python list of masked_language_model
    # calls (one per vocab size); only the 'single' header is exercised here.
    return masked_language_model(
        x, params.w1, params.b1, params.w2, params.b2,
        compute_dtype=kwargs.get("compute_dtype", jnp.bfloat16))


if __name__ == "__main__":
    # Small shapes consistent with a BERT-style decoder head:
    # x : (batch=2, seq=8, hidden=32), vocab_size=48
    batch, seq, hidden_dim, vocab_size = 2, 8, 32, 48

    key = jax.random.PRNGKey(0)
    kx, kp = jax.random.split(key)
    x = jax.random.normal(kx, (batch, seq, hidden_dim), jnp.float32)
    params = DecoderParams(kp, hidden_dim, vocab_size)

    # Default (performance) path: bf16 MXU operands, f32 accumulation.
    out = decoder_forward(params, x)
    out = jax.block_until_ready(out)

    # Exact-parity path for the tight numerics check.
    out_f32 = decoder_forward(params, x, compute_dtype=jnp.float32)
    out_f32 = jax.block_until_ready(out_f32)

    # Reference check against plain JAX (same math as the PyTorch module).
    ref = jnp.maximum(x @ params.w1 + params.b1, 0.0) @ params.w2 + params.b2
    assert out.shape == (batch, seq, vocab_size)
    assert out_f32.shape == (batch, seq, vocab_size)
    assert jnp.allclose(out_f32, ref, atol=1e-5, rtol=1e-5)
    # bf16 operands -> relaxed tolerance vs the f32 reference.
    assert jnp.allclose(out.astype(jnp.float32), ref, atol=6e-2, rtol=6e-2)

    print("KERNEL_OK")
</pallas_src>

<mosaic_0001>
module attributes {stable_mosaic.version = 11 : i64} {
  func.func @mlm_kernel(%arg0: i32, %arg1: i32, %arg2: memref<16x128xbf16, #tpu.memory_space<vmem>>, %arg3: memref<128x128xbf16, #tpu.memory_space<vmem>>, %arg4: memref<1x128xf32, #tpu.memory_space<vmem>>, %arg5: memref<128x128xbf16, #tpu.memory_space<vmem>>, %arg6: memref<1x128xf32, #tpu.memory_space<vmem>>, %arg7: memref<16x128xf32, #tpu.memory_space<vmem>>, %arg8: memref<16x128xbf16, #tpu.memory_space<vmem>>) attributes {dimension_semantics = [#tpu.dimension_semantics<parallel>, #tpu.dimension_semantics<arbitrary>], iteration_bounds = array<i64: 1, 1>, scalar_prefetch = 0 : i64, scratch_operands = 1 : i64, tpu.core_type = #tpu.core_type<tc>, window_params = [{transform_indices = @transform_0, window_bounds = array<i64: 16, 128>}, {pipeline_mode = #tpu.pipeline_mode<synchronous>, transform_indices = @transform_1, window_bounds = array<i64: 128, 128>}, {pipeline_mode = #tpu.pipeline_mode<synchronous>, transform_indices = @transform_2, window_bounds = array<i64: 1, 128>}, {transform_indices = @transform_3, window_bounds = array<i64: 128, 128>}, {transform_indices = @transform_4, window_bounds = array<i64: 1, 128>}, {transform_indices = @transform_5, window_bounds = array<i64: 16, 128>}]} {
    %c0_i32 = arith.constant 0 : i32
    %0 = arith.cmpi eq, %arg1, %c0_i32 : i32
    %1 = arith.extui %0 : i1 to i32
    %c0_i32_0 = arith.constant 0 : i32
    %2 = arith.cmpi ne, %1, %c0_i32_0 : i32
    scf.if %2 {
      %c0_8 = arith.constant 0 : index
      %c0_9 = arith.constant 0 : index
      %10 = vector.load %arg2[%c0_8, %c0_9] : memref<16x128xbf16, #tpu.memory_space<vmem>>, vector<16x128xbf16>
      %c0_10 = arith.constant 0 : index
      %c0_11 = arith.constant 0 : index
      %11 = vector.load %arg3[%c0_10, %c0_11] : memref<128x128xbf16, #tpu.memory_space<vmem>>, vector<128x128xbf16>
      %cst_12 = arith.constant dense<0.000000e+00> : vector<16x128xf32>
      %12 = tpu.matmul %10, %11, %cst_12 {dimension_numbers = #tpu.dot_dimension_numbers<[1], [0], [0], [1], [0, 0, 1, 1], [], []>} : vector<16x128xbf16>, vector<128x128xbf16>, vector<16x128xf32> -> vector<16x128xf32>
      %c0_13 = arith.constant 0 : index
      %c0_14 = arith.constant 0 : index
      %13 = vector.load %arg4[%c0_13, %c0_14] : memref<1x128xf32, #tpu.memory_space<vmem>>, vector<1x128xf32>
      %14 = vector.broadcast %13 : vector<1x128xf32> to vector<16x128xf32>
      %15 = arith.addf %12, %14 : vector<16x128xf32>
      %cst_15 = arith.constant 0.000000e+00 : f32
      %16 = vector.broadcast %cst_15 : f32 to vector<16x128xf32>
      %17 = arith.maximumf %15, %16 : vector<16x128xf32>
      %18 = arith.truncf %17 : vector<16x128xf32> to vector<16x128xbf16>
      %c0_16 = arith.constant 0 : index
      %c0_17 = arith.constant 0 : index
      %19 = vector.load %arg8[%c0_16, %c0_17] : memref<16x128xbf16, #tpu.memory_space<vmem>>, vector<16x128xbf16>
      tpu.vector_store %arg8[%c0_16, %c0_17], %18 {strides = array<i32>} : memref<16x128xbf16, #tpu.memory_space<vmem>>, vector<16x128xbf16>,
    } else {
    }
    %c0 = arith.constant 0 : index
    %c0_1 = arith.constant 0 : index
    %3 = vector.load %arg8[%c0, %c0_1] : memref<16x128xbf16, #tpu.memory_space<vmem>>, vector<16x128xbf16>
    %c0_2 = arith.constant 0 : index
    %c0_3 = arith.constant 0 : index
    %4 = vector.load %arg5[%c0_2, %c0_3] : memref<128x128xbf16, #tpu.memory_space<vmem>>, vector<128x128xbf16>
    %cst = arith.constant dense<0.000000e+00> : vector<16x128xf32>
    %5 = tpu.matmul %3, %4, %cst {dimension_numbers = #tpu.dot_dimension_numbers<[1], [0], [0], [1], [0, 0, 1, 1], [], []>} : vector<16x128xbf16>, vector<128x128xbf16>, vector<16x128xf32> -> vector<16x128xf32>
    %c0_4 = arith.constant 0 : index
    %c0_5 = arith.constant 0 : index
    %6 = vector.load %arg6[%c0_4, %c0_5] : memref<1x128xf32, #tpu.memory_space<vmem>>, vector<1x128xf32>
    %7 = vector.broadcast %6 : vector<1x128xf32> to vector<16x128xf32>
    %8 = arith.addf %5, %7 : vector<16x128xf32>
    %c0_6 = arith.constant 0 : index
    %c0_7 = arith.constant 0 : index
    %9 = vector.load %arg7[%c0_6, %c0_7] : memref<16x128xf32, #tpu.memory_space<vmem>>, vector<16x128xf32>
    tpu.vector_store %arg7[%c0_6, %c0_7], %8 {strides = array<i32>} : memref<16x128xf32, #tpu.memory_space<vmem>>, vector<16x128xf32>,
    return
  }
  func.func @transform_0(%arg0: i32, %arg1: i32) -> (i32, i32) {
    %c0_i32 = arith.constant 0 : i32
    %c0_i32_0 = arith.constant 0 : i32
    return %arg0, %c0_i32 : i32, i32
  }
  func.func @transform_1(%arg0: i32, %arg1: i32) -> (i32, i32) {
    %c0_i32 = arith.constant 0 : i32
    %c0_i32_0 = arith.constant 0 : i32
    %c0_i32_1 = arith.constant 0 : i32
    return %c0_i32, %c0_i32_0 : i32, i32
  }
  func.func @transform_2(%arg0: i32, %arg1: i32) -> (i32, i32) {
    %c0_i32 = arith.constant 0 : i32
    %c0_i32_0 = arith.constant 0 : i32
    %c0_i32_1 = arith.constant 0 : i32
    return %c0_i32, %c0_i32_0 : i32, i32
  }
  func.func @transform_3(%arg0: i32, %arg1: i32) -> (i32, i32) {
    %c0_i32 = arith.constant 0 : i32
    %c0_i32_0 = arith.constant 0 : i32
    return %c0_i32, %arg1 : i32, i32
  }
  func.func @transform_4(%arg0: i32, %arg1: i32) -> (i32, i32) {
    %c0_i32 = arith.constant 0 : i32
    %c0_i32_0 = arith.constant 0 : i32
    return %c0_i32, %arg1 : i32, i32
  }
  func.func @transform_5(%arg0: i32, %arg1: i32) -> (i32, i32) {
    %c0_i32 = arith.constant 0 : i32
    return %arg0, %arg1 : i32, i32
  }
}

module attributes {stable_mosaic.version = 11 : i64} {
  func.func @mlm_kernel(%arg0: i32, %arg1: i32, %arg2: memref<16x128xbf16, #tpu.memory_space<vmem>>, %arg3: memref<128x128xbf16, #tpu.memory_space<vmem>>, %arg4: memref<1x128xf32, #tpu.memory_space<vmem>>, %arg5: memref<128x128xbf16, #tpu.memory_space<vmem>>, %arg6: memref<1x128xf32, #tpu.memory_space<vmem>>, %arg7: memref<16x128xf32, #tpu.memory_space<vmem>>, %arg8: memref<16x128xbf16, #tpu.memory_space<vmem>>) attributes {dimension_semantics = [#tpu.dimension_semantics<parallel>, #tpu.dimension_semantics<arbitrary>], iteration_bounds = array<i64: 1, 1>, scalar_prefetch = 0 : i64, scratch_operands = 1 : i64, tpu.core_type = #tpu.core_type<tc>, window_params = [{transform_indices = @transform_0, window_bounds = array<i64: 16, 128>}, {pipeline_mode = #tpu.pipeline_mode<synchronous>, transform_indices = @transform_1, window_bounds = array<i64: 128, 128>}, {pipeline_mode = #tpu.pipeline_mode<synchronous>, transform_indices = @transform_2, window_bounds = array<i64: 1, 128>}, {transform_indices = @transform_3, window_bounds = array<i64: 128, 128>}, {transform_indices = @transform_4, window_bounds = array<i64: 1, 128>}, {transform_indices = @transform_5, window_bounds = array<i64: 16, 128>}]} {
    %c0_i32 = arith.constant 0 : i32
    %0 = arith.cmpi eq, %arg1, %c0_i32 : i32
    %1 = arith.extui %0 : i1 to i32
    %c0_i32_0 = arith.constant 0 : i32
    %2 = arith.cmpi ne, %1, %c0_i32_0 : i32
    scf.if %2 {
      %c0_8 = arith.constant 0 : index
      %c0_9 = arith.constant 0 : index
      %10 = vector.load %arg2[%c0_8, %c0_9] : memref<16x128xbf16, #tpu.memory_space<vmem>>, vector<16x128xbf16>
      %c0_10 = arith.constant 0 : index
      %c0_11 = arith.constant 0 : index
      %11 = vector.load %arg3[%c0_10, %c0_11] : memref<128x128xbf16, #tpu.memory_space<vmem>>, vector<128x128xbf16>
      %cst_12 = arith.constant dense<0.000000e+00> : vector<16x128xf32>
      %12 = tpu.matmul %10, %11, %cst_12 {dimension_numbers = #tpu.dot_dimension_numbers<[1], [0], [0], [1], [0, 0, 1, 1], [], []>} : vector<16x128xbf16>, vector<128x128xbf16>, vector<16x128xf32> -> vector<16x128xf32>
      %c0_13 = arith.constant 0 : index
      %c0_14 = arith.constant 0 : index
      %13 = vector.load %arg4[%c0_13, %c0_14] : memref<1x128xf32, #tpu.memory_space<vmem>>, vector<1x128xf32>
      %14 = vector.broadcast %13 : vector<1x128xf32> to vector<16x128xf32>
      %15 = arith.addf %12, %14 : vector<16x128xf32>
      %cst_15 = arith.constant 0.000000e+00 : f32
      %16 = vector.broadcast %cst_15 : f32 to vector<16x128xf32>
      %17 = arith.maximumf %15, %16 : vector<16x128xf32>
      %18 = arith.truncf %17 : vector<16x128xf32> to vector<16x128xbf16>
      %c0_16 = arith.constant 0 : index
      %c0_17 = arith.constant 0 : index
      %19 = vector.load %arg8[%c0_16, %c0_17] : memref<16x128xbf16, #tpu.memory_space<vmem>>, vector<16x128xbf16>
      tpu.vector_store %arg8[%c0_16, %c0_17], %18 {strides = array<i32>} : memref<16x128xbf16, #tpu.memory_space<vmem>>, vector<16x128xbf16>,
    } else {
    }
    %c0 = arith.constant 0 : index
    %c0_1 = arith.constant 0 : index
    %3 = vector.load %arg8[%c0, %c0_1] : memref<16x128xbf16, #tpu.memory_space<vmem>>, vector<16x128xbf16>
    %c0_2 = arith.constant 0 : index
    %c0_3 = arith.constant 0 : index
    %4 = vector.load %arg5[%c0_2, %c0_3] : memref<128x128xbf16, #tpu.memory_space<vmem>>, vector<128x128xbf16>
    %cst = arith.constant dense<0.000000e+00> : vector<16x128xf32>
    %5 = tpu.matmul %3, %4, %cst {dimension_numbers = #tpu.dot_dimension_numbers<[1], [0], [0], [1], [0, 0, 1, 1], [], []>} : vector<16x128xbf16>, vector<128x128xbf16>, vector<16x128xf32> -> vector<16x128xf32>
    %c0_4 = arith.constant 0 : index
    %c0_5 = arith.constant 0 : index
    %6 = vector.load %arg6[%c0_4, %c0_5] : memref<1x128xf32, #tpu.memory_space<vmem>>, vector<1x128xf32>
    %7 = vector.broadcast %6 : vector<1x128xf32> to vector<16x128xf32>
    %8 = arith.addf %5, %7 : vector<16x128xf32>
    %c0_6 = arith.constant 0 : index
    %c0_7 = arith.constant 0 : index
    %9 = vector.load %arg7[%c0_6, %c0_7] : memref<16x128xf32, #tpu.memory_space<vmem>>, vector<16x128xf32>
    tpu.vector_store %arg7[%c0_6, %c0_7], %8 {strides = array<i32>} : memref<16x128xf32, #tpu.memory_space<vmem>>, vector<16x128xf32>,
    return
  }
  func.func @transform_0(%arg0: i32, %arg1: i32) -> (i32, i32) {
    %c0_i32 = arith.constant 0 : i32
    %c0_i32_0 = arith.constant 0 : i32
    return %arg0, %c0_i32 : i32, i32
  }
  func.func @transform_1(%arg0: i32, %arg1: i32) -> (i32, i32) {
    %c0_i32 = arith.constant 0 : i32
    %c0_i32_0 = arith.constant 0 : i32
    %c0_i32_1 = arith.constant 0 : i32
    return %c0_i32, %c0_i32_0 : i32, i32
  }
  func.func @transform_2(%arg0: i32, %arg1: i32) -> (i32, i32) {
    %c0_i32 = arith.constant 0 : i32
    %c0_i32_0 = arith.constant 0 : i32
    %c0_i32_1 = arith.constant 0 : i32
    return %c0_i32, %c0_i32_0 : i32, i32
  }
  func.func @transform_3(%arg0: i32, %arg1: i32) -> (i32, i32) {
    %c0_i32 = arith.constant 0 : i32
    %c0_i32_0 = arith.constant 0 : i32
    return %c0_i32, %arg1 : i32, i32
  }
  func.func @transform_4(%arg0: i32, %arg1: i32) -> (i32, i32) {
    %c0_i32 = arith.constant 0 : i32
    %c0_i32_0 = arith.constant 0 : i32
    return %c0_i32, %arg1 : i32, i32
  }
  func.func @transform_5(%arg0: i32, %arg1: i32) -> (i32, i32) {
    %c0_i32 = arith.constant 0 : i32
    return %arg0, %arg1 : i32, i32
  }
}

</mosaic_0001>

<bundles_post_ra>
// kernel: tpu_custom_call.1
= control target key start
LH: loop header
LB: loop body
LE: loop exit
PB: predicated region body
PF: predicated region fallthrough
CT: control target
= control target key end

     0   :  { %10 = vsyncpa [#allocation4], 0  ;;  %s632_s0 = inlined_call_operand.hbm [shape: bf16[16,128], index: 0, kind: input, shape index: {}]   ;;  %s633_s1 = inlined_call_operand.hbm [shape: bf16[128,128], index: 1, kind: input, shape index: {}]   ;;  %s634_s2 = inlined_call_operand.vmem [shape: f32[1,128], index: 2, kind: input, shape index: {}]   ;;  %s635_s3 = inlined_call_operand.hbm [shape: bf16[128,128], index: 3, kind: input, shape index: {}]   ;;  %s636_s4 = inlined_call_operand.vmem [shape: f32[1,128], index: 4, kind: input, shape index: {}]   ;;  %s637_s5 = inlined_call_operand.hbm [shape: f32[16,128], index: 5, kind: output, shape index: {}]  }
   0x1   :  { %11 = vsyncpa [#allocation7], 0 }
   0x2   :  { %12 = vsyncpa [#allocation5], 0  ;;  %s522_s18 = smov [#allocation6]   ;;  %s523_s20 = smov [#allocation3]  }
   0x3   :  { %s30_s19 = sshll.u32 %s522_s18, 4  ;;  %s18_s21 = sshll.u32 %s523_s20, 4  ;;  %s31_s19 = int_to_ptr.vmem [resolvable:$true] %s30_s19  ;;  %s562_s21 = int_to_ptr.vmem [resolvable:$true] %s18_s21 }
   0x4   :  { %s428_s24 = scalar_lea.hbm %s633_s1, 1024 }
   0x5   :  { %p429_p0 = scmp.ne.s32.totalorder %s633_s1, %s428_s24  ;;  %p432_p1 = scmp.lt.u32.totalorder %s428_s24, %s633_s1 }
   0x7   :  { %p434_p2 = pnand %p432_p1, %p429_p0 }
   0x9   :  { %437 = shalt.err (!%p434_p2)
}
   0xa   :  { %s438_s29 = scalar_lea.vmem %s31_s19, 1024  ;;  %p443_p4 = scmp.lt.s32.totalorder %s31_s19, %s31_s19 }
   0xb   :  { %p439_p3 = scmp.ne.s32.totalorder %s31_s19, %s438_s29  ;;  %p444_p5 = scmp.lt.s32.totalorder %s438_s29, %s438_s29 }
   0xd   :  { %p445_p6 = por %p444_p5, %p443_p4 }
   0xf   :  { %p446_p7 = pnand %p445_p6, %p439_p3 }
  0x11   :  { %449 = shalt.err (!%p446_p7)
}
  0x12   :  { %s524_s30 = smov 64   ;;  %s525_s6 = smov 4  }
  0x13   :  { %36 = dma.hbm_to_vmem [thread:$0]  %s633_s1, 1024, %s31_s19, [#allocation7], %s524_s30, %s524_s30, %s525_s6  }
  0x14   :  { %s450_s11 = scalar_lea.hbm %s632_s0, 128 }
  0x15   :  { %p451_p8 = scmp.ne.s32.totalorder %s632_s0, %s450_s11  ;;  %p454_p9 = scmp.lt.u32.totalorder %s450_s11, %s632_s0 }
  0x17   :  { %p456_p10 = pnand %p454_p9, %p451_p8 }
  0x19   :  { %459 = shalt.err (!%p456_p10)
}
  0x1a   :  { %s460_s16 = scalar_lea.vmem %s562_s21, 128  ;;  %p465_p12 = scmp.lt.s32.totalorder %s562_s21, %s562_s21 }
  0x1b   :  { %p461_p11 = scmp.ne.s32.totalorder %s562_s21, %s460_s16  ;;  %p466_p13 = scmp.lt.s32.totalorder %s460_s16, %s460_s16 }
  0x1d   :  { %p467_p0 = por %p466_p13, %p465_p12 }
  0x1f   :  { %p468_p1 = pnand %p467_p0, %p461_p11 }
  0x21   :  { %471 = shalt.err (!%p468_p1)
}
  0x22   :  { %24 = dma.hbm_to_vmem [thread:$0]  %s632_s0, 128, %s562_s21, [#allocation4], %s524_s30, %s524_s30, %s525_s6  }
  0x23   :  { %s526_s18 = smov [#allocation8]   ;;  %s472_s23 = scalar_lea.hbm %s635_s3, 1024 }
  0x24   :  { %s44_s19 = sshll.u32 %s526_s18, 4  ;;  %p473_p2 = scmp.ne.s32.totalorder %s635_s3, %s472_s23  ;;  %s45_s19 = int_to_ptr.vmem [resolvable:$true] %s44_s19 }
  0x25   :  { %p476_p3 = scmp.lt.u32.totalorder %s472_s23, %s635_s3 }
  0x27   :  { %p478_p4 = pnand %p476_p3, %p473_p2 }
  0x29   :  { %481 = shalt.err (!%p478_p4)
}
  0x2a   :  { %s482_s28 = scalar_lea.vmem %s45_s19, 1024  ;;  %p487_p6 = scmp.lt.s32.totalorder %s45_s19, %s45_s19 }
  0x2b   :  { %p483_p5 = scmp.ne.s32.totalorder %s45_s19, %s482_s28  ;;  %p488_p7 = scmp.lt.s32.totalorder %s482_s28, %s482_s28 }
  0x2d   :  { %p489_p8 = por %p488_p7, %p487_p6 }
  0x2f   :  { %p490_p9 = pnand %p489_p8, %p483_p5 }
  0x31   :  { %493 = shalt.err (!%p490_p9)
}
  0x32   :  { %50 = dma.hbm_to_vmem [thread:$0]  %s635_s3, 1024, %s45_s19, [#allocation7], %s524_s30, %s524_s30, %s525_s6  }
  0x33   :  { %516 = dma.done.wait [#allocation4], 128  }
  0x34   :  { %517 = vsyncadd [#allocation4], 4294967168 }
  0x35   :  { %518 = dma.done.wait [#allocation7], 2048  }
  0x36   :  { %519 = vsyncadd [#allocation7], 4294965248  ;;  %v527_v0 = vmov 0.0   ;;  %vm528_vm0 = vmmov 0   ;;  %v411_v1 = vld [vmem:[#allocation6] sm:$0xff]   ;;  %v412_v2 = vld [vmem:[#allocation6 + $0x8] sm:$0xff]  }
  0x37   :  { %361 = vmatprep.subr.bf16.mxu0 %v527_v0  ;;  %377 = vmatprep.mubr.msk.bf16.mxu0 %vm528_vm0, %v527_v0  ;;  %v413_v3 = vld [vmem:[#allocation6 + $0x10] sm:$0xff]   ;;  %v420_v4 = vld [vmem:[#allocation8] sm:$0xff]   ;;  %v414_v5 = vld [vmem:[#allocation6 + $0x18] sm:$0xff]   ;;  %s529_s7 = smov [#allocation9]  }
  0x38   :  { %381 = vmatprep.subr.bf16.mxu1 %v527_v0  ;;  %397 = vmatprep.mubr.msk.bf16.mxu1 %vm528_vm0, %v527_v0  ;;  %v421_v6 = vld [vmem:[#allocation8 + $0x8] sm:$0xff]   ;;  %v415_v7 = vld [vmem:[#allocation6 + $0x20] sm:$0xff]   ;;  %v422_v8 = vld [vmem:[#allocation8 + $0x10] sm:$0xff]   ;;  %s311_s8 = sshll.u32 %s529_s7, 4  ;;  %s312_s8 = int_to_ptr.vmem [resolvable:$true] %s311_s8 }
  0x39   :  { %362 = vmatpush3.bf16.msra.mxu0 %v411_v1  ;;  %382 = vmatpush3.bf16.msra.mxu1 %v420_v4  ;;  %v416_v9 = vld [vmem:[#allocation6 + $0x28] sm:$0xff]   ;;  %v423_v10 = vld [vmem:[#allocation8 + $0x18] sm:$0xff]   ;;  %v417_v11 = vld [vmem:[#allocation6 + $0x30] sm:$0xff]   ;;  %p499_p11 = scmp.lt.s32.totalorder %s312_s8, %s312_s8 }
  0x3a   :  { %363 = vmatprep.subr.bf16.mxu0 %v527_v0  ;;  %383 = vmatprep.subr.bf16.mxu1 %v527_v0  ;;  %v424_v12 = vld [vmem:[#allocation8 + $0x20] sm:$0xff]   ;;  %v418_v13 = vld [vmem:[#allocation6 + $0x38] sm:$0xff]   ;;  %v425_v14 = vld [vmem:[#allocation8 + $0x28] sm:$0xff]  }
  0x3b   :  { %v419_v15 = vld [vmem:[#allocation3] sm:$0xff]   ;;  %v426_v16 = vld [vmem:[#allocation8 + $0x30] sm:$0xff]  }
  0x3c   :  { %v427_v17 = vld [vmem:[#allocation8 + $0x38] sm:$0xff]  }
  0x3d   :  { %364 = vmatpush3.bf16.msra.mxu0 %v412_v2  ;;  %384 = vmatpush3.bf16.msra.mxu1 %v421_v6  ;;  %v324_v18 = vld [vmem:[%s634_s2] ss:$0 sm:$0xff]  ;;  %s494_s2 = scalar_lea.vmem %s312_s8, 256 }
  0x3e   :  { %365 = vmatprep.subr.bf16.mxu0 %v527_v0  ;;  %385 = vmatprep.subr.bf16.mxu1 %v527_v0  ;;  %v334_v28 = vld [vmem:[%s636_s4] ss:$0 sm:$0xff]  ;;  %p495_p10 = scmp.ne.s32.totalorder %s312_s8, %s494_s2  ;;  %p500_p12 = scmp.lt.s32.totalorder %s494_s2, %s494_s2 }
  0x40   :  { %p501_p13 = por %p500_p12, %p499_p11 }
  0x41   :  { %366 = vmatpush3.bf16.msra.mxu0 %v413_v3  ;;  %386 = vmatpush3.bf16.msra.mxu1 %v422_v8 }
  0x42   :  { %367 = vmatprep.subr.bf16.mxu0 %v527_v0  ;;  %387 = vmatprep.subr.bf16.mxu1 %v527_v0  ;;  %p502_p0 = pnand %p501_p13, %p495_p10 }
  0x45   :  { %368 = vmatpush3.bf16.msra.mxu0 %v414_v5  ;;  %388 = vmatpush3.bf16.msra.mxu1 %v423_v10 }
  0x46   :  { %369 = vmatprep.subr.bf16.mxu0 %v527_v0  ;;  %389 = vmatprep.subr.bf16.mxu1 %v527_v0 }
  0x49   :  { %370 = vmatpush3.bf16.msra.mxu0 %v415_v7  ;;  %390 = vmatpush3.bf16.msra.mxu1 %v424_v12 }
  0x4a   :  { %371 = vmatprep.subr.bf16.mxu0 %v527_v0  ;;  %391 = vmatprep.subr.bf16.mxu1 %v527_v0 }
  0x4d   :  { %372 = vmatpush3.bf16.msra.mxu0 %v416_v9  ;;  %392 = vmatpush3.bf16.msra.mxu1 %v425_v14 }
  0x4e   :  { %373 = vmatprep.subr.bf16.mxu0 %v527_v0  ;;  %393 = vmatprep.subr.bf16.mxu1 %v527_v0 }
  0x51   :  { %374 = vmatpush3.bf16.msra.mxu0 %v417_v11  ;;  %394 = vmatpush3.bf16.msra.mxu1 %v426_v16 }
  0x52   :  { %375 = vmatprep.subr.bf16.mxu0 %v527_v0  ;;  %395 = vmatprep.subr.bf16.mxu1 %v527_v0 }
  0x55   :  { %376 = vmatpush3.bf16.msra.mxu0 %v418_v13  ;;  %396 = vmatpush3.bf16.msra.mxu1 %v427_v17 }
  0x58   :  { %378 = vmatmul.mubr.bf16.vlgmr.msra.gmra.mrb[0].mxu0 %v419_v15 }
 0x12b   :  { %v180_v19 = vpop.f32.mrb[0].mxu0 }
 0x12c   :  { %v181_v20 = vadd.f32 %v324_v18, %v180_v19  ;;  %v379_v21 = vpop.f32.mrb[1].mxu0 }
 0x12d   :  { %v183_v22 = vpop.f32.mrb[2].mxu0 }
 0x12e   :  { %v184_v23 = vadd.f32 %v324_v18, %v183_v22  ;;  %v380_v24 = vpop.f32.mrb[3].mxu0  ;;  %v187_v25 = vmax.f32 %v181_v20, 0.0 }
 0x130   :  { %v188_v26 = vmax.f32 %v184_v23, 0.0 }
 0x132   :  { %v189_v27 = vpack.c.bf16 %v188_v26, %v187_v25 }
 0x134   :  { %398 = vmatmul.mubr.bf16.vlgmr.msra.gmra.mrb[0].mxu1 %v189_v27 }
 0x207   :  { %v297_v29 = vpop.f32.mrb[0].mxu1 }
 0x208   :  { %v298_v30 = vadd.f32 %v334_v28, %v297_v29  ;;  %v399_v31 = vpop.f32.mrb[1].mxu1 }
 0x209   :  { %v300_v32 = vpop.f32.mrb[2].mxu1 }
 0x20a   :  { %304 = vst [vmem:[#allocation9] sm:$0xff] %v298_v30  ;;  %v301_v33 = vadd.f32 %v334_v28, %v300_v32  ;;  %v400_v34 = vpop.f32.mrb[3].mxu1 }
 0x20c   :  { %305 = vst [vmem:[#allocation9 + $0x8] sm:$0xff] %v301_v33 }
 0x20d   :  { %505 = shalt.err (!%p502_p0)
}
 0x20e   :  { %s506_s10 = scalar_lea.hbm %s637_s5, 256 }
 0x20f   :  { %p507_p1 = scmp.ne.s32.totalorder %s637_s5, %s506_s10  ;;  %p510_p2 = scmp.lt.u32.totalorder %s506_s10, %s637_s5 }
 0x211   :  { %p512_p3 = pnand %p510_p2, %p507_p1 }
 0x213   :  { %515 = shalt.err (!%p512_p3)
}
 0x214   :  { %s530_s15 = smov 128   ;;  %s531_s16 = smov 8  }
 0x215   :  { %317 = dma.vmem_to_hbm [thread:$0]  %s312_s8, 256, %s637_s5, [#allocation5], %s530_s15, %s530_s15, %s531_s16  }
 0x216   :  { %520 = dma.done.wait [#allocation5], 256  }
 0x217   :  { %521 = vsyncadd [#allocation5], 4294967040 }
 0x218   :  { %321 = vsyncpa [#allocation4], 1 }
 0x219   :  { %322 = vsyncpa [#allocation7], 1 }
 0x21a   :  { %323 = vsyncpa [#allocation5], 1 }

// kernel: tpu_custom_call.1
= control target key start
LH: loop header
LB: loop body
LE: loop exit
PB: predicated region body
PF: predicated region fallthrough
CT: control target
= control target key end

     0   :  { %10 = vsyncpa [#allocation4], 0  ;;  %s632_s0 = inlined_call_operand.hbm [shape: bf16[16,128], index: 0, kind: input, shape index: {}]   ;;  %s633_s1 = inlined_call_operand.hbm [shape: bf16[128,128], index: 1, kind: input, shape index: {}]   ;;  %s634_s2 = inlined_call_operand.vmem [shape: f32[1,128], index: 2, kind: input, shape index: {}]   ;;  %s635_s3 = inlined_call_operand.hbm [shape: bf16[128,128], index: 3, kind: input, shape index: {}]   ;;  %s636_s4 = inlined_call_operand.vmem [shape: f32[1,128], index: 4, kind: input, shape index: {}]   ;;  %s637_s5 = inlined_call_operand.hbm [shape: f32[16,128], index: 5, kind: output, shape index: {}]  }
   0x1   :  { %11 = vsyncpa [#allocation7], 0 }
   0x2   :  { %12 = vsyncpa [#allocation5], 0  ;;  %s522_s18 = smov [#allocation6]   ;;  %s523_s20 = smov [#allocation3]  }
   0x3   :  { %s30_s19 = sshll.u32 %s522_s18, 4  ;;  %s18_s21 = sshll.u32 %s523_s20, 4  ;;  %s31_s19 = int_to_ptr.vmem [resolvable:$true] %s30_s19  ;;  %s562_s21 = int_to_ptr.vmem [resolvable:$true] %s18_s21 }
   0x4   :  { %s428_s24 = scalar_lea.hbm %s633_s1, 1024 }
   0x5   :  { %p429_p0 = scmp.ne.s32.totalorder %s633_s1, %s428_s24  ;;  %p432_p1 = scmp.lt.u32.totalorder %s428_s24, %s633_s1 }
   0x7   :  { %p434_p2 = pnand %p432_p1, %p429_p0 }
   0x9   :  { %437 = shalt.err (!%p434_p2)
}
   0xa   :  { %s438_s29 = scalar_lea.vmem %s31_s19, 1024  ;;  %p443_p4 = scmp.lt.s32.totalorder %s31_s19, %s31_s19 }
   0xb   :  { %p439_p3 = scmp.ne.s32.totalorder %s31_s19, %s438_s29  ;;  %p444_p5 = scmp.lt.s32.totalorder %s438_s29, %s438_s29 }
   0xd   :  { %p445_p6 = por %p444_p5, %p443_p4 }
   0xf   :  { %p446_p7 = pnand %p445_p6, %p439_p3 }
  0x11   :  { %449 = shalt.err (!%p446_p7)
}
  0x12   :  { %s524_s30 = smov 64   ;;  %s525_s6 = smov 4  }
  0x13   :  { %36 = dma.hbm_to_vmem [thread:$0]  %s633_s1, 1024, %s31_s19, [#allocation7], %s524_s30, %s524_s30, %s525_s6  }
  0x14   :  { %s450_s11 = scalar_lea.hbm %s632_s0, 128 }
  0x15   :  { %p451_p8 = scmp.ne.s32.totalorder %s632_s0, %s450_s11  ;;  %p454_p9 = scmp.lt.u32.totalorder %s450_s11, %s632_s0 }
  0x17   :  { %p456_p10 = pnand %p454_p9, %p451_p8 }
  0x19   :  { %459 = shalt.err (!%p456_p10)
}
  0x1a   :  { %s460_s16 = scalar_lea.vmem %s562_s21, 128  ;;  %p465_p12 = scmp.lt.s32.totalorder %s562_s21, %s562_s21 }
  0x1b   :  { %p461_p11 = scmp.ne.s32.totalorder %s562_s21, %s460_s16  ;;  %p466_p13 = scmp.lt.s32.totalorder %s460_s16, %s460_s16 }
  0x1d   :  { %p467_p0 = por %p466_p13, %p465_p12 }
  0x1f   :  { %p468_p1 = pnand %p467_p0, %p461_p11 }
  0x21   :  { %471 = shalt.err (!%p468_p1)
}
  0x22   :  { %24 = dma.hbm_to_vmem [thread:$0]  %s632_s0, 128, %s562_s21, [#allocation4], %s524_s30, %s524_s30, %s525_s6  }
  0x23   :  { %s526_s18 = smov [#allocation8]   ;;  %s472_s23 = scalar_lea.hbm %s635_s3, 1024 }
  0x24   :  { %s44_s19 = sshll.u32 %s526_s18, 4  ;;  %p473_p2 = scmp.ne.s32.totalorder %s635_s3, %s472_s23  ;;  %s45_s19 = int_to_ptr.vmem [resolvable:$true] %s44_s19 }
  0x25   :  { %p476_p3 = scmp.lt.u32.totalorder %s472_s23, %s635_s3 }
  0x27   :  { %p478_p4 = pnand %p476_p3, %p473_p2 }
  0x29   :  { %481 = shalt.err (!%p478_p4)
}
  0x2a   :  { %s482_s28 = scalar_lea.vmem %s45_s19, 1024  ;;  %p487_p6 = scmp.lt.s32.totalorder %s45_s19, %s45_s19 }
  0x2b   :  { %p483_p5 = scmp.ne.s32.totalorder %s45_s19, %s482_s28  ;;  %p488_p7 = scmp.lt.s32.totalorder %s482_s28, %s482_s28 }
  0x2d   :  { %p489_p8 = por %p488_p7, %p487_p6 }
  0x2f   :  { %p490_p9 = pnand %p489_p8, %p483_p5 }
  0x31   :  { %493 = shalt.err (!%p490_p9)
}
  0x32   :  { %50 = dma.hbm_to_vmem [thread:$0]  %s635_s3, 1024, %s45_s19, [#allocation7], %s524_s30, %s524_s30, %s525_s6  }
  0x33   :  { %516 = dma.done.wait [#allocation4], 128  }
  0x34   :  { %517 = vsyncadd [#allocation4], 4294967168 }
  0x35   :  { %518 = dma.done.wait [#allocation7], 2048  }
  0x36   :  { %519 = vsyncadd [#allocation7], 4294965248  ;;  %v527_v0 = vmov 0.0   ;;  %vm528_vm0 = vmmov 0   ;;  %v411_v1 = vld [vmem:[#allocation6] sm:$0xff]   ;;  %v412_v2 = vld [vmem:[#allocation6 + $0x8] sm:$0xff]  }
  0x37   :  { %361 = vmatprep.subr.bf16.mxu0 %v527_v0  ;;  %377 = vmatprep.mubr.msk.bf16.mxu0 %vm528_vm0, %v527_v0  ;;  %v413_v3 = vld [vmem:[#allocation6 + $0x10] sm:$0xff]   ;;  %v420_v4 = vld [vmem:[#allocation8] sm:$0xff]   ;;  %v414_v5 = vld [vmem:[#allocation6 + $0x18] sm:$0xff]   ;;  %s529_s7 = smov [#allocation9]  }
  0x38   :  { %381 = vmatprep.subr.bf16.mxu1 %v527_v0  ;;  %397 = vmatprep.mubr.msk.bf16.mxu1 %vm528_vm0, %v527_v0  ;;  %v421_v6 = vld [vmem:[#allocation8 + $0x8] sm:$0xff]   ;;  %v415_v7 = vld [vmem:[#allocation6 + $0x20] sm:$0xff]   ;;  %v422_v8 = vld [vmem:[#allocation8 + $0x10] sm:$0xff]   ;;  %s311_s8 = sshll.u32 %s529_s7, 4  ;;  %s312_s8 = int_to_ptr.vmem [resolvable:$true] %s311_s8 }
  0x39   :  { %362 = vmatpush3.bf16.msra.mxu0 %v411_v1  ;;  %382 = vmatpush3.bf16.msra.mxu1 %v420_v4  ;;  %v416_v9 = vld [vmem:[#allocation6 + $0x28] sm:$0xff]   ;;  %v423_v10 = vld [vmem:[#allocation8 + $0x18] sm:$0xff]   ;;  %v417_v11 = vld [vmem:[#allocation6 + $0x30] sm:$0xff]   ;;  %p499_p11 = scmp.lt.s32.totalorder %s312_s8, %s312_s8 }
  0x3a   :  { %363 = vmatprep.subr.bf16.mxu0 %v527_v0  ;;  %383 = vmatprep.subr.bf16.mxu1 %v527_v0  ;;  %v424_v12 = vld [vmem:[#allocation8 + $0x20] sm:$0xff]   ;;  %v418_v13 = vld [vmem:[#allocation6 + $0x38] sm:$0xff]   ;;  %v425_v14 = vld [vmem:[#allocation8 + $0x28] sm:$0xff]  }
  0x3b   :  { %v419_v15 = vld [vmem:[#allocation3] sm:$0xff]   ;;  %v426_v16 = vld [vmem:[#allocation8 + $0x30] sm:$0xff]  }
  0x3c   :  { %v427_v17 = vld [vmem:[#allocation8 + $0x38] sm:$0xff]  }
  0x3d   :  { %364 = vmatpush3.bf16.msra.mxu0 %v412_v2  ;;  %384 = vmatpush3.bf16.msra.mxu1 %v421_v6  ;;  %v324_v18 = vld [vmem:[%s634_s2] ss:$0 sm:$0xff]  ;;  %s494_s2 = scalar_lea.vmem %s312_s8, 256 }
  0x3e   :  { %365 = vmatprep.subr.bf16.mxu0 %v527_v0  ;;  %385 = vmatprep.subr.bf16.mxu1 %v527_v0  ;;  %v334_v28 = vld [vmem:[%s636_s4] ss:$0 sm:$0xff]  ;;  %p495_p10 = scmp.ne.s32.totalorder %s312_s8, %s494_s2  ;;  %p500_p12 = scmp.lt.s32.totalorder %s494_s2, %s494_s2 }
  0x40   :  { %p501_p13 = por %p500_p12, %p499_p11 }
  0x41   :  { %366 = vmatpush3.bf16.msra.mxu0 %v413_v3  ;;  %386 = vmatpush3.bf16.msra.mxu1 %v422_v8 }
  0x42   :  { %367 = vmatprep.subr.bf16.mxu0 %v527_v0  ;;  %387 = vmatprep.subr.bf16.mxu1 %v527_v0  ;;  %p502_p0 = pnand %p501_p13, %p495_p10 }
  0x45   :  { %368 = vmatpush3.bf16.msra.mxu0 %v414_v5  ;;  %388 = vmatpush3.bf16.msra.mxu1 %v423_v10 }
  0x46   :  { %369 = vmatprep.subr.bf16.mxu0 %v527_v0  ;;  %389 = vmatprep.subr.bf16.mxu1 %v527_v0 }
  0x49   :  { %370 = vmatpush3.bf16.msra.mxu0 %v415_v7  ;;  %390 = vmatpush3.bf16.msra.mxu1 %v424_v12 }
  0x4a   :  { %371 = vmatprep.subr.bf16.mxu0 %v527_v0  ;;  %391 = vmatprep.subr.bf16.mxu1 %v527_v0 }
  0x4d   :  { %372 = vmatpush3.bf16.msra.mxu0 %v416_v9  ;;  %392 = vmatpush3.bf16.msra.mxu1 %v425_v14 }
  0x4e   :  { %373 = vmatprep.subr.bf16.mxu0 %v527_v0  ;;  %393 = vmatprep.subr.bf16.mxu1 %v527_v0 }
  0x51   :  { %374 = vmatpush3.bf16.msra.mxu0 %v417_v11  ;;  %394 = vmatpush3.bf16.msra.mxu1 %v426_v16 }
  0x52   :  { %375 = vmatprep.subr.bf16.mxu0 %v527_v0  ;;  %395 = vmatprep.subr.bf16.mxu1 %v527_v0 }
  0x55   :  { %376 = vmatpush3.bf16.msra.mxu0 %v418_v13  ;;  %396 = vmatpush3.bf16.msra.mxu1 %v427_v17 }
  0x58   :  { %378 = vmatmul.mubr.bf16.vlgmr.msra.gmra.mrb[0].mxu0 %v419_v15 }
 0x12b   :  { %v180_v19 = vpop.f32.mrb[0].mxu0 }
 0x12c   :  { %v181_v20 = vadd.f32 %v324_v18, %v180_v19  ;;  %v379_v21 = vpop.f32.mrb[1].mxu0 }
 0x12d   :  { %v183_v22 = vpop.f32.mrb[2].mxu0 }
 0x12e   :  { %v184_v23 = vadd.f32 %v324_v18, %v183_v22  ;;  %v380_v24 = vpop.f32.mrb[3].mxu0  ;;  %v187_v25 = vmax.f32 %v181_v20, 0.0 }
 0x130   :  { %v188_v26 = vmax.f32 %v184_v23, 0.0 }
 0x132   :  { %v189_v27 = vpack.c.bf16 %v188_v26, %v187_v25 }
 0x134   :  { %398 = vmatmul.mubr.bf16.vlgmr.msra.gmra.mrb[0].mxu1 %v189_v27 }
 0x207   :  { %v297_v29 = vpop.f32.mrb[0].mxu1 }
 0x208   :  { %v298_v30 = vadd.f32 %v334_v28, %v297_v29  ;;  %v399_v31 = vpop.f32.mrb[1].mxu1 }
 0x209   :  { %v300_v32 = vpop.f32.mrb[2].mxu1 }
 0x20a   :  { %304 = vst [vmem:[#allocation9] sm:$0xff] %v298_v30  ;;  %v301_v33 = vadd.f32 %v334_v28, %v300_v32  ;;  %v400_v34 = vpop.f32.mrb[3].mxu1 }
 0x20c   :  { %305 = vst [vmem:[#allocation9 + $0x8] sm:$0xff] %v301_v33 }
 0x20d   :  { %505 = shalt.err (!%p502_p0)
}
 0x20e   :  { %s506_s10 = scalar_lea.hbm %s637_s5, 256 }
 0x20f   :  { %p507_p1 = scmp.ne.s32.totalorder %s637_s5, %s506_s10  ;;  %p510_p2 = scmp.lt.u32.totalorder %s506_s10, %s637_s5 }
 0x211   :  { %p512_p3 = pnand %p510_p2, %p507_p1 }
 0x213   :  { %515 = shalt.err (!%p512_p3)
}
 0x214   :  { %s530_s15 = smov 128   ;;  %s531_s16 = smov 8  }
 0x215   :  { %317 = dma.vmem_to_hbm [thread:$0]  %s312_s8, 256, %s637_s5, [#allocation5], %s530_s15, %s530_s15, %s531_s16  }
 0x216   :  { %520 = dma.done.wait [#allocation5], 256  }
 0x217   :  { %521 = vsyncadd [#allocation5], 4294967040 }
 0x218   :  { %321 = vsyncpa [#allocation4], 1 }
 0x219   :  { %322 = vsyncpa [#allocation7], 1 }
 0x21a   :  { %323 = vsyncpa [#allocation5], 1 }

</bundles_post_ra>
